<compile_context>
chip_gen: v5e
topology: v5e:2x2
jax: 0.10.0
libtpu: 0.0.40
codegen_flags: <defaults>
</compile_context>

<pallas_src>
import functools

import jax
import jax.numpy as jnp
from jax.experimental import pallas as pl
from jax.experimental.pallas import tpu as pltpu

H1 = 100          # first hidden width  (torch: Linear(input_size, 100))
H2 = 10           # second hidden width (torch: Linear(100, 10))
LANE = 128
SUBLANE = 8
DEFAULT_TILE_B = 2048
VMEM_BUDGET_BYTES = 24 * 1024 * 1024   # conservative: fits every gen's scoped VMEM


def _round_up(x, m):
    return (x + m - 1) // m * m


def _pad_to(a, shape):
    pads = [(0, t - s) for s, t in zip(a.shape, shape)]
    return jnp.pad(a, pads)


def mlp_kernel(x_ref, w1_ref, b1_ref, w2_ref, b2_ref, w3_ref, b3_ref, o_ref, *, out_dim):
    # One batch tile: three fused matmul+bias+sigmoid stages, all f32.
    x = x_ref[...]                                                      # (TB, d_in) f32
    z1 = jnp.dot(x, w1_ref[...], preferred_element_type=jnp.float32) + b1_ref[...]
    h1 = jax.nn.sigmoid(z1)                                             # (TB, 128) f32
    z2 = jnp.dot(h1, w2_ref[...], preferred_element_type=jnp.float32) + b2_ref[...]
    h2 = jax.nn.sigmoid(z2)                                             # (TB, 128) f32
    z3 = jnp.dot(h2, w3_ref[...], preferred_element_type=jnp.float32) + b3_ref[...]
    # Slice off the padded output lanes before the store: only true-width
    # (tile_b, out_dim) rows ever hit HBM.
    o_ref[...] = jax.nn.sigmoid(z3)[:, :out_dim]


@functools.partial(jax.jit, static_argnames=("tile_b",))
def mlp_forward(x, params, *, tile_b=DEFAULT_TILE_B):
    """Runs the fused MLP forward pass. x: (batch, input_size) float32."""
    w1, b1, w2, b2, w3, b3 = params
    batch, d_in = x.shape
    out_dim = w3.shape[1]

    # Lane-pad only the hidden / output dims of the tiny, VMEM-resident weights.
    h1_p = _round_up(H1, LANE)                      # 128
    h2_p = _round_up(H2, LANE)                      # 128
    out_p = _round_up(max(out_dim, LANE), LANE)     # 128 for output_size=1

    # Zero padding: padded ROWS of w2/w3 are zero -> exactness invariant (header).
    w1_p = _pad_to(w1.astype(jnp.float32), (d_in, h1_p))
    b1_p = _pad_to(b1.reshape(1, -1).astype(jnp.float32), (1, h1_p))
    w2_p = _pad_to(w2.astype(jnp.float32), (h1_p, h2_p))
    b2_p = _pad_to(b2.reshape(1, -1).astype(jnp.float32), (1, h2_p))
    w3_p = _pad_to(w3.astype(jnp.float32), (h2_p, out_p))
    b3_p = _pad_to(b3.reshape(1, -1).astype(jnp.float32), (1, out_p))

    # Tile the batch: large tiles amortize per-step overhead; clamp so the
    # double-buffered x/out tiles + f32 intermediates stay well inside scoped
    # VMEM on every generation, and split into >=2 tiles when the batch allows
    # it so v7x megacore actually uses both TensorCores.
    row_bytes = 4 * (2 * d_in + 4 * max(h1_p, h2_p, out_p) + 2 * out_dim)
    vmem_cap = max(SUBLANE, (VMEM_BUDGET_BYTES // row_bytes) // SUBLANE * SUBLANE)
    tile_b = min(tile_b, vmem_cap)
    tile_b = min(tile_b, max(SUBLANE, _round_up(pl.cdiv(batch, 2), SUBLANE)))
    grid = (pl.cdiv(batch, tile_b),)

    def resident(shape):
        # Same block for every grid step -> stays resident in VMEM.
        return pl.BlockSpec(shape, lambda i: (0, 0))

    weight_bytes = 4 * (w1_p.size + b1_p.size + w2_p.size + b2_p.size
                        + w3_p.size + b3_p.size)
    cost = pl.CostEstimate(
        flops=2 * batch * (d_in * H1 + H1 * H2 + H2 * out_dim),
        transcendentals=batch * (H1 + H2 + out_dim),
        bytes_accessed=x.size * 4 + batch * out_dim * 4 + weight_bytes,
    )

    out = pl.pallas_call(
        functools.partial(mlp_kernel, out_dim=out_dim),
        out_shape=jax.ShapeDtypeStruct((batch, out_dim), jnp.float32),
        grid=grid,
        in_specs=[
            # Streamed raw f32 x tile; last block dim == full array dim (legal).
            pl.BlockSpec((tile_b, d_in), lambda i: (i, 0)),
            resident((d_in, h1_p)),
            resident((1, h1_p)),
            resident((h1_p, h2_p)),
            resident((1, h2_p)),
            resident((h2_p, out_p)),
            resident((1, out_p)),
        ],
        # True-width output block; last block dim == full array dim (legal).
        out_specs=pl.BlockSpec((tile_b, out_dim), lambda i: (i, 0)),
        compiler_params=pltpu.CompilerParams(
            dimension_semantics=("parallel",),    # shard batch tiles across v7x TCs
            vmem_limit_bytes=32 * 1024 * 1024,
        ),
        cost_estimate=cost,
    )(x.astype(jnp.float32), w1_p, b1_p, w2_p, b2_p, w3_p, b3_p)

    return out


def init_params(key, input_size, output_size=1):
    """Deterministic init mirroring the torch layer shapes ((in, out) layout)."""
    dims = [(input_size, H1), (H1, H2), (H2, output_size)]
    params = []
    for i, (fan_in, fan_out) in enumerate(dims):
        kw, kb = jax.random.split(jax.random.fold_in(key, i))
        bound = 1.0 / jnp.sqrt(jnp.float32(fan_in))
        w = jax.random.uniform(kw, (fan_in, fan_out), jnp.float32, -bound, bound)
        b = jax.random.uniform(kb, (1, fan_out), jnp.float32, -bound, bound)
        params += [w, b]
    return tuple(params)


def mlp_reference(x, params):
    """Pure-JAX f32 reference for correctness checking."""
    w1, b1, w2, b2, w3, b3 = params
    h1 = jax.nn.sigmoid(x @ w1 + b1)
    h2 = jax.nn.sigmoid(h1 @ w2 + b2)
    return jax.nn.sigmoid(h2 @ w3 + b3)


if __name__ == "__main__":
    key = jax.random.PRNGKey(0)
    batch, input_size, output_size = 8, 16, 1

    k_x, k_p, k_x2 = jax.random.split(key, 3)
    params = init_params(k_p, input_size, output_size)

    # Small canonical test (single tile).
    x = jax.random.normal(k_x, (batch, input_size), jnp.float32)
    out = jax.block_until_ready(mlp_forward(x, params))
    ref = mlp_reference(x, params)
    assert out.shape == (batch, output_size)
    assert jnp.allclose(out, ref, atol=1e-2), float(jnp.abs(out - ref).max())

    # Larger, non-tile-multiple batch: exercises the multi-tile grid and the
    # ragged final tile (garbage rows only reach discarded output rows).
    x2 = jax.random.normal(k_x2, (1000, input_size), jnp.float32)
    out2 = jax.block_until_ready(mlp_forward(x2, params))
    ref2 = mlp_reference(x2, params)
    assert out2.shape == (1000, output_size)
    assert jnp.allclose(out2, ref2, atol=1e-2), float(jnp.abs(out2 - ref2).max())

    print("KERNEL_OK")
</pallas_src>

<mosaic_0001>
module attributes {stable_mosaic.version = 11 : i64} {
  func.func @mlp_kernel(%arg0: i32, %arg1: memref<8x16xf32, #tpu.memory_space<vmem>>, %arg2: memref<16x128xf32, #tpu.memory_space<vmem>>, %arg3: memref<1x128xf32, #tpu.memory_space<vmem>>, %arg4: memref<128x128xf32, #tpu.memory_space<vmem>>, %arg5: memref<1x128xf32, #tpu.memory_space<vmem>>, %arg6: memref<128x128xf32, #tpu.memory_space<vmem>>, %arg7: memref<1x128xf32, #tpu.memory_space<vmem>>, %arg8: memref<8x1xf32, #tpu.memory_space<vmem>>) attributes {dimension_semantics = [#tpu.dimension_semantics<parallel>], iteration_bounds = array<i64: 1>, scalar_prefetch = 0 : i64, scratch_operands = 0 : i64, tpu.core_type = #tpu.core_type<tc>, window_params = [{transform_indices = @transform_0, window_bounds = array<i64: 8, 16>}, {pipeline_mode = #tpu.pipeline_mode<synchronous>, transform_indices = @transform_1, window_bounds = array<i64: 16, 128>}, {pipeline_mode = #tpu.pipeline_mode<synchronous>, transform_indices = @transform_2, window_bounds = array<i64: 1, 128>}, {pipeline_mode = #tpu.pipeline_mode<synchronous>, transform_indices = @transform_3, window_bounds = array<i64: 128, 128>}, {pipeline_mode = #tpu.pipeline_mode<synchronous>, transform_indices = @transform_4, window_bounds = array<i64: 1, 128>}, {pipeline_mode = #tpu.pipeline_mode<synchronous>, transform_indices = @transform_5, window_bounds = array<i64: 128, 128>}, {pipeline_mode = #tpu.pipeline_mode<synchronous>, transform_indices = @transform_6, window_bounds = array<i64: 1, 128>}, {transform_indices = @transform_7, window_bounds = array<i64: 8, 1>}]} {
    %c0 = arith.constant 0 : index
    %c0_0 = arith.constant 0 : index
    %0 = vector.load %arg1[%c0, %c0_0] : memref<8x16xf32, #tpu.memory_space<vmem>>, vector<8x16xf32>
    %c0_1 = arith.constant 0 : index
    %c0_2 = arith.constant 0 : index
    %1 = vector.load %arg2[%c0_1, %c0_2] : memref<16x128xf32, #tpu.memory_space<vmem>>, vector<16x128xf32>
    %cst = arith.constant dense<0.000000e+00> : vector<8x128xf32>
    %2 = tpu.matmul %0, %1, %cst {dimension_numbers = #tpu.dot_dimension_numbers<[1], [0], [0], [1], [0, 0, 1, 1], [], []>} : vector<8x16xf32>, vector<16x128xf32>, vector<8x128xf32> -> vector<8x128xf32>
    %c0_3 = arith.constant 0 : index
    %c0_4 = arith.constant 0 : index
    %3 = vector.load %arg3[%c0_3, %c0_4] : memref<1x128xf32, #tpu.memory_space<vmem>>, vector<1x128xf32>
    %4 = vector.broadcast %3 : vector<1x128xf32> to vector<8x128xf32>
    %5 = arith.addf %2, %4 : vector<8x128xf32>
    %6 = arith.negf %5 : vector<8x128xf32>
    %7 = math.exp %6 : vector<8x128xf32>
    %cst_5 = arith.constant 1.000000e+00 : f32
    %8 = vector.broadcast %cst_5 : f32 to vector<8x128xf32>
    %9 = arith.addf %8, %7 : vector<8x128xf32>
    %10 = arith.divf %8, %9 : vector<8x128xf32>
    %c0_6 = arith.constant 0 : index
    %c0_7 = arith.constant 0 : index
    %11 = vector.load %arg4[%c0_6, %c0_7] : memref<128x128xf32, #tpu.memory_space<vmem>>, vector<128x128xf32>
    %cst_8 = arith.constant dense<0.000000e+00> : vector<8x128xf32>
    %12 = tpu.matmul %10, %11, %cst_8 {dimension_numbers = #tpu.dot_dimension_numbers<[1], [0], [0], [1], [0, 0, 1, 1], [], []>} : vector<8x128xf32>, vector<128x128xf32>, vector<8x128xf32> -> vector<8x128xf32>
    %c0_9 = arith.constant 0 : index
    %c0_10 = arith.constant 0 : index
    %13 = vector.load %arg5[%c0_9, %c0_10] : memref<1x128xf32, #tpu.memory_space<vmem>>, vector<1x128xf32>
    %14 = vector.broadcast %13 : vector<1x128xf32> to vector<8x128xf32>
    %15 = arith.addf %12, %14 : vector<8x128xf32>
    %16 = arith.negf %15 : vector<8x128xf32>
    %17 = math.exp %16 : vector<8x128xf32>
    %cst_11 = arith.constant 1.000000e+00 : f32
    %18 = vector.broadcast %cst_11 : f32 to vector<8x128xf32>
    %19 = arith.addf %18, %17 : vector<8x128xf32>
    %20 = arith.divf %18, %19 : vector<8x128xf32>
    %c0_12 = arith.constant 0 : index
    %c0_13 = arith.constant 0 : index
    %21 = vector.load %arg6[%c0_12, %c0_13] : memref<128x128xf32, #tpu.memory_space<vmem>>, vector<128x128xf32>
    %cst_14 = arith.constant dense<0.000000e+00> : vector<8x128xf32>
    %22 = tpu.matmul %20, %21, %cst_14 {dimension_numbers = #tpu.dot_dimension_numbers<[1], [0], [0], [1], [0, 0, 1, 1], [], []>} : vector<8x128xf32>, vector<128x128xf32>, vector<8x128xf32> -> vector<8x128xf32>
    %c0_15 = arith.constant 0 : index
    %c0_16 = arith.constant 0 : index
    %23 = vector.load %arg7[%c0_15, %c0_16] : memref<1x128xf32, #tpu.memory_space<vmem>>, vector<1x128xf32>
    %24 = vector.broadcast %23 : vector<1x128xf32> to vector<8x128xf32>
    %25 = arith.addf %22, %24 : vector<8x128xf32>
    %26 = arith.negf %25 : vector<8x128xf32>
    %27 = math.exp %26 : vector<8x128xf32>
    %cst_17 = arith.constant 1.000000e+00 : f32
    %28 = vector.broadcast %cst_17 : f32 to vector<8x128xf32>
    %29 = arith.addf %28, %27 : vector<8x128xf32>
    %30 = arith.divf %28, %29 : vector<8x128xf32>
    %31 = vector.extract_strided_slice %30 {offsets = [0, 0], sizes = [8, 1], strides = [1, 1]} : vector<8x128xf32> to vector<8x1xf32>
    %c0_18 = arith.constant 0 : index
    %c0_19 = arith.constant 0 : index
    %32 = vector.load %arg8[%c0_18, %c0_19] : memref<8x1xf32, #tpu.memory_space<vmem>>, vector<8x1xf32>
    tpu.vector_store %arg8[%c0_18, %c0_19], %31 {strides = array<i32>} : memref<8x1xf32, #tpu.memory_space<vmem>>, vector<8x1xf32>,
    return
  }
  func.func @transform_0(%arg0: i32) -> (i32, i32) {
    %c0_i32 = arith.constant 0 : i32
    %c0_i32_0 = arith.constant 0 : i32
    return %arg0, %c0_i32 : i32, i32
  }
  func.func @transform_1(%arg0: i32) -> (i32, i32) {
    %c0_i32 = arith.constant 0 : i32
    %c0_i32_0 = arith.constant 0 : i32
    %c0_i32_1 = arith.constant 0 : i32
    return %c0_i32, %c0_i32_0 : i32, i32
  }
  func.func @transform_2(%arg0: i32) -> (i32, i32) {
    %c0_i32 = arith.constant 0 : i32
    %c0_i32_0 = arith.constant 0 : i32
    %c0_i32_1 = arith.constant 0 : i32
    return %c0_i32, %c0_i32_0 : i32, i32
  }
  func.func @transform_3(%arg0: i32) -> (i32, i32) {
    %c0_i32 = arith.constant 0 : i32
    %c0_i32_0 = arith.constant 0 : i32
    %c0_i32_1 = arith.constant 0 : i32
    return %c0_i32, %c0_i32_0 : i32, i32
  }
  func.func @transform_4(%arg0: i32) -> (i32, i32) {
    %c0_i32 = arith.constant 0 : i32
    %c0_i32_0 = arith.constant 0 : i32
    %c0_i32_1 = arith.constant 0 : i32
    return %c0_i32, %c0_i32_0 : i32, i32
  }
  func.func @transform_5(%arg0: i32) -> (i32, i32) {
    %c0_i32 = arith.constant 0 : i32
    %c0_i32_0 = arith.constant 0 : i32
    %c0_i32_1 = arith.constant 0 : i32
    return %c0_i32, %c0_i32_0 : i32, i32
  }
  func.func @transform_6(%arg0: i32) -> (i32, i32) {
    %c0_i32 = arith.constant 0 : i32
    %c0_i32_0 = arith.constant 0 : i32
    %c0_i32_1 = arith.constant 0 : i32
    return %c0_i32, %c0_i32_0 : i32, i32
  }
  func.func @transform_7(%arg0: i32) -> (i32, i32) {
    %c0_i32 = arith.constant 0 : i32
    %c0_i32_0 = arith.constant 0 : i32
    return %arg0, %c0_i32 : i32, i32
  }
}

</mosaic_0001>

<bundles_post_ra>
// kernel: mlp_forward.1
= control target key start
LH: loop header
LB: loop body
LE: loop exit
PB: predicated region body
PF: predicated region fallthrough
CT: control target
= control target key end

     0   :  { %vm33_vm0 = vcmask 130048   ;;  %vm194_vm12 = vcmask 7168   ;;  %s376_s1 = inlined_call_operand.vmem [shape: f32[16,128], index: 1, kind: input, shape index: {}]   ;;  %s377_s0 = inlined_call_operand.vmem [shape: f32[8,16], index: 0, kind: input, shape index: {}]   ;;  %s378_s2 = inlined_call_operand.vmem [shape: f32[1,128], index: 2, kind: input, shape index: {}]   ;;  %s379_s4 = inlined_call_operand.vmem [shape: f32[1,128], index: 4, kind: input, shape index: {}]   ;;  %s380_s3 = inlined_call_operand.vmem [shape: f32[128,128], index: 3, kind: input, shape index: {}]   ;;  %s381_s6 = inlined_call_operand.vmem [shape: f32[1,128], index: 6, kind: input, shape index: {}]   ;;  %s382_s5 = inlined_call_operand.vmem [shape: f32[128,128], index: 5, kind: input, shape index: {}]   ;;  %s383_s7 = inlined_call_operand.vmem [shape: f32[8,1], index: 7, kind: output, shape index: {}]  }
   0x1   :  { %v28_v0 = vld [vmem:[%s376_s1 + $0x8] sm:$0xff]  ;;  %v27_v1 = vld [vmem:[%s376_s1] sm:$0xff]  ;;  %v91_v3 = vld [vmem:[%s380_s3 + $0x78] sm:$0xff] }
   0x2   :  { %51 = vmatpush.msra.mxu0 %v28_v0  ;;  %v26_v2 = vld [vmem:[%s377_s0] sm:$0xff]  ;;  %96 = vmatpush.msra.mxu1 %v91_v3  ;;  %v90_v4 = vld [vmem:[%s380_s3 + $0x70] sm:$0xff]  ;;  %v89_v5 = vld [vmem:[%s380_s3 + $0x68] sm:$0xff] }
   0x3   :  { %v88_v6 = vld [vmem:[%s380_s3 + $0x60] sm:$0xff]  ;;  %v87_v7 = vld [vmem:[%s380_s3 + $0x58] sm:$0xff]  ;;  %v86_v8 = vld [vmem:[%s380_s3 + $0x50] sm:$0xff] }
   0x4   :  { %52 = vmatpush.msra.mxu0 %v27_v1  ;;  %97 = vmatpush.msra.mxu1 %v90_v4  ;;  %v85_v9 = vld [vmem:[%s380_s3 + $0x48] sm:$0xff]  ;;  %v84_v10 = vld [vmem:[%s380_s3 + $0x40] sm:$0xff]  ;;  %v83_v11 = vld [vmem:[%s380_s3 + $0x38] sm:$0xff] }
   0x5   :  { %200 = vmatmul.msk.f32.vlgmr.msra.gmra.mxu0 %vm33_vm0, %v26_v2  ;;  %v82_v12 = vld [vmem:[%s380_s3 + $0x30] sm:$0xff]  ;;  %v81_v13 = vld [vmem:[%s380_s3 + $0x28] sm:$0xff]  ;;  %v80_v14 = vld [vmem:[%s380_s3 + $0x20] sm:$0xff] }
   0x6   :  { %98 = vmatpush.msra.mxu1 %v89_v5  ;;  %v79_v15 = vld [vmem:[%s380_s3 + $0x18] sm:$0xff]  ;;  %v78_v16 = vld [vmem:[%s380_s3 + $0x10] sm:$0xff]  ;;  %v77_v17 = vld [vmem:[%s380_s3 + $0x8] sm:$0xff] }
   0x7   :  { %v76_v18 = vld [vmem:[%s380_s3] sm:$0xff]  ;;  %v150_v35 = vld [vmem:[%s382_s5 + $0x78] sm:$0xff]  ;;  %v149_v36 = vld [vmem:[%s382_s5 + $0x70] sm:$0xff] }
   0x8   :  { %99 = vmatpush.msra.mxu1 %v88_v6  ;;  %v204_v19 = vld [vmem:[%s378_s2] ss:$0 sm:$0xff]  ;;  %155 = vmatpush.msra.mxu2 %v150_v35  ;;  %v148_v37 = vld [vmem:[%s382_s5 + $0x68] sm:$0xff]  ;;  %v146_v39 = vld [vmem:[%s382_s5 + $0x58] sm:$0xff] }
   0x9   :  { %v147_v38 = vld [vmem:[%s382_s5 + $0x60] sm:$0xff]  ;;  %v145_v40 = vld [vmem:[%s382_s5 + $0x50] sm:$0xff]  ;;  %v144_v41 = vld [vmem:[%s382_s5 + $0x48] sm:$0xff] }
   0xa   :  { %100 = vmatpush.msra.mxu1 %v87_v7  ;;  %156 = vmatpush.msra.mxu2 %v149_v36  ;;  %v143_v42 = vld [vmem:[%s382_s5 + $0x40] sm:$0xff]  ;;  %v142_v43 = vld [vmem:[%s382_s5 + $0x38] sm:$0xff]  ;;  %v141_v44 = vld [vmem:[%s382_s5 + $0x30] sm:$0xff] }
   0xb   :  { %v140_v45 = vld [vmem:[%s382_s5 + $0x28] sm:$0xff]  ;;  %v139_v46 = vld [vmem:[%s382_s5 + $0x20] sm:$0xff]  ;;  %v138_v47 = vld [vmem:[%s382_s5 + $0x18] sm:$0xff] }
   0xc   :  { %101 = vmatpush.msra.mxu1 %v86_v8  ;;  %157 = vmatpush.msra.mxu2 %v148_v37  ;;  %v137_v48 = vld [vmem:[%s382_s5 + $0x10] sm:$0xff]  ;;  %v136_v49 = vld [vmem:[%s382_s5 + $0x8] sm:$0xff]  ;;  %v135_v50 = vld [vmem:[%s382_s5] sm:$0xff] }
   0xd   :  { %v205_v51 = vld [vmem:[%s379_s4] ss:$0 sm:$0xff] }
   0xe   :  { %102 = vmatpush.msra.mxu1 %v85_v9  ;;  %158 = vmatpush.msra.mxu2 %v147_v38  ;;  %v206_v3 = vld [vmem:[%s381_s6] ss:$0 sm:$0xff] }
  0x10   :  { %103 = vmatpush.msra.mxu1 %v84_v10  ;;  %159 = vmatpush.msra.mxu2 %v146_v39 }
  0x12   :  { %104 = vmatpush.msra.mxu1 %v83_v11  ;;  %160 = vmatpush.msra.mxu2 %v145_v40 }
  0x14   :  { %105 = vmatpush.msra.mxu1 %v82_v12  ;;  %161 = vmatpush.msra.mxu2 %v144_v41 }
  0x16   :  { %106 = vmatpush.msra.mxu1 %v81_v13  ;;  %162 = vmatpush.msra.mxu2 %v143_v42 }
  0x18   :  { %107 = vmatpush.msra.mxu1 %v80_v14  ;;  %163 = vmatpush.msra.mxu2 %v142_v43 }
  0x1a   :  { %108 = vmatpush.msra.mxu1 %v79_v15  ;;  %164 = vmatpush.msra.mxu2 %v141_v44 }
  0x1c   :  { %109 = vmatpush.msra.mxu1 %v78_v16  ;;  %165 = vmatpush.msra.mxu2 %v140_v45 }
  0x1e   :  { %110 = vmatpush.msra.mxu1 %v77_v17  ;;  %166 = vmatpush.msra.mxu2 %v139_v46 }
  0x20   :  { %111 = vmatpush.msra.mxu1 %v76_v18  ;;  %167 = vmatpush.msra.mxu2 %v138_v47 }
  0x22   :  { %168 = vmatpush.msra.mxu2 %v137_v48 }
  0x24   :  { %169 = vmatpush.msra.mxu2 %v136_v49 }
  0x26   :  { %170 = vmatpush.msra.mxu2 %v135_v50 }
  0x82   :  { %v54_v20 = vpop.f32.mrf.mxu0 }
  0x83   :  { %v55_v21 = vadd.f32 %v204_v19, %v54_v20 }
  0x85   :  { %v201_v22 = vmul.f32 -1.442695, %v55_v21 }
  0x87   :  { %207 = vpow2.f32 %v201_v22 }
  0x8d   :  { %v208_v23 = vpop.eup %207 }
  0x8e   :  { %v60_v24 = vadd.f32 1.0, %v208_v23 }
  0x90   :  { %209 = vrcp.f32 %v60_v24  ;;  %v72_v28 = vand.u32 2147483648, %v60_v24  ;;  %v70_v30 = vand.u32 2147483647, %v60_v24  ;;  %vm66_vm2 = vweird.f32 %v60_v24 }
  0x92   :  { %v73_v32 = vor.u32 1.1754944e-38, %v72_v28  ;;  %vm71_vm4 = vcmp.eq.f32.partialorder %v70_v30, 8.507059e+37 }
  0x96   :  { %v210_v25 = vpop.eup %209 }
  0x97   :  { %v62_v26 = vmul.f32 %v210_v25, %v60_v24  ;;  %vm67_vm1 = vweird.f32 %v210_v25 }
  0x98   :  { %vm68_vm3 = vmor %vm66_vm2, %vm67_vm1 }
  0x99   :  { %v63_v27 = vsub.f32 1.0, %v62_v26 }
  0x9b   :  { %v64_v29 = vmul.f32 %v210_v25, %v63_v27 }
  0x9d   :  { %v65_v31 = vadd.f32 %v210_v25, %v64_v29 }
  0x9f   :  { %v69_v33 = vsel %vm68_vm3, %v210_v25, %v65_v31 }
  0xa0   :  { %v74_v34 = vsel %vm71_vm4, %v73_v32, %v69_v33 }
  0xa1   :  { %112 = vmatmul.f32.vlgmr.msra.gmra.mxu1 %v74_v34 }
 0x11e   :  { %v113_v52 = vpop.f32.mrf.mxu1 }
 0x11f   :  { %v114_v53 = vadd.f32 %v205_v51, %v113_v52 }
 0x121   :  { %v202_v54 = vmul.f32 -1.442695, %v114_v53 }
 0x123   :  { %211 = vpow2.f32 %v202_v54 }
 0x129   :  { %v212_v55 = vpop.eup %211 }
 0x12a   :  { %v119_v56 = vadd.f32 1.0, %v212_v55 }
 0x12c   :  { %213 = vrcp.f32 %v119_v56  ;;  %v131_v60 = vand.u32 2147483648, %v119_v56  ;;  %v129_v62 = vand.u32 2147483647, %v119_v56  ;;  %vm125_vm6 = vweird.f32 %v119_v56 }
 0x12e   :  { %v132_v0 = vor.u32 1.1754944e-38, %v131_v60  ;;  %vm130_vm8 = vcmp.eq.f32.partialorder %v129_v62, 8.507059e+37 }
 0x132   :  { %v214_v57 = vpop.eup %213 }
 0x133   :  { %v121_v58 = vmul.f32 %v214_v57, %v119_v56  ;;  %vm126_vm5 = vweird.f32 %v214_v57 }
 0x134   :  { %vm127_vm7 = vmor %vm125_vm6, %vm126_vm5 }
 0x135   :  { %v122_v59 = vsub.f32 1.0, %v121_v58 }
 0x137   :  { %v123_v61 = vmul.f32 %v214_v57, %v122_v59 }
 0x139   :  { %v124_v63 = vadd.f32 %v214_v57, %v123_v61 }
 0x13b   :  { %v128_v1 = vsel %vm127_vm7, %v214_v57, %v124_v63 }
 0x13c   :  { %v133_v2 = vsel %vm130_vm8, %v132_v0, %v128_v1 }
 0x13d   :  { %171 = vmatmul.f32.vlgmr.msra.gmra.mxu2 %v133_v2 }
 0x1c0   :  { %v172_v4 = vpop.f32.mrf.mxu2 }
 0x1c1   :  { %v173_v5 = vadd.f32 %v206_v3, %v172_v4 }
 0x1c3   :  { %v203_v6 = vmul.f32 -1.442695, %v173_v5 }
 0x1c5   :  { %215 = vpow2.f32 %v203_v6 }
 0x1cb   :  { %v216_v7 = vpop.eup %215 }
 0x1cc   :  { %v178_v8 = vadd.f32 1.0, %v216_v7 }
 0x1ce   :  { %217 = vrcp.f32 %v178_v8  ;;  %v190_v12 = vand.u32 2147483648, %v178_v8  ;;  %v188_v14 = vand.u32 2147483647, %v178_v8  ;;  %vm184_vm10 = vweird.f32 %v178_v8 }
 0x1d0   :  { %v191_v16 = vor.u32 1.1754944e-38, %v190_v12  ;;  %vm189_vm13 = vcmp.eq.f32.partialorder %v188_v14, 8.507059e+37 }
 0x1d4   :  { %v218_v9 = vpop.eup %217 }
 0x1d5   :  { %v180_v10 = vmul.f32 %v218_v9, %v178_v8  ;;  %vm185_vm9 = vweird.f32 %v218_v9 }
 0x1d6   :  { %vm186_vm11 = vmor %vm184_vm10, %vm185_vm9 }
 0x1d7   :  { %v181_v11 = vsub.f32 1.0, %v180_v10 }
 0x1d9   :  { %v182_v13 = vmul.f32 %v218_v9, %v181_v11 }
 0x1db   :  { %v183_v15 = vadd.f32 %v218_v9, %v182_v13 }
 0x1dd   :  { %v187_v17 = vsel %vm186_vm11, %v218_v9, %v183_v15 }
 0x1de   :  { %v192_v18 = vsel %vm189_vm13, %v191_v16, %v187_v17 }
 0x1df   :  { %195 = vst.msk [vmem:[%s383_s7] sm:$0xff] %vm194_vm12, %v192_v18 }

</bundles_post_ra>
